<compile_context>
chip_gen: v7x
topology: tpu7x:2x2x1
jax: 0.10.0
libtpu: 0.0.40
codegen_flags: <defaults>
</compile_context>

<pallas_src>
import functools

import jax
import jax.numpy as jnp
from jax import lax
from jax.experimental import pallas as pl
from jax.experimental.pallas import tpu as pltpu


def _round_up(x, m):
    return ((x + m - 1) // m) * m


def _cdiv(a, b):
    return (a + b - 1) // b


def _vmem_limit_bytes():
    # Generation-aware scoped-VMEM limit: ~75% of physical, capped at 96 MiB
    # (v7x: 48 MiB of 64 MiB, v5e/v6e: 96 MiB of 128 MiB).
    try:
        cap = pltpu.get_tpu_info().vmem_capacity_bytes
    except Exception:
        cap = 128 * 1024 * 1024
    return int(min(cap * 3 // 4, 96 * 1024 * 1024))


_VMEM_LIMIT = _vmem_limit_bytes()
_ROW_BUDGET = 12 * 1024 * 1024   # per-grid-step activation budget for the fused convs


# ----------------------------------------------------------------------------
# Kernel family 1: tiled matmul + bias + (optional) LeakyReLU
# ----------------------------------------------------------------------------
def _mm_bias_act_1pass_kernel(x_ref, w_ref, b_ref, o_ref, *, alpha, apply_act):
    # nk == 1 fast path (all 1x1 convs here): no f32 scratch, no phase gating.
    y = jnp.dot(x_ref[...], w_ref[...], preferred_element_type=jnp.float32) + b_ref[...]
    if apply_act:
        y = jnp.maximum(y, alpha * y)          # LeakyReLU, single VPU op
    o_ref[...] = y.astype(o_ref.dtype)


def _mm_bias_act_kernel(x_ref, w_ref, b_ref, o_ref, acc_ref, *, nk, alpha, apply_act):
    @pl.when(pl.program_id(2) == 0)
    def _():
        acc_ref[...] = jnp.zeros_like(acc_ref)

    acc_ref[...] += jnp.dot(x_ref[...], w_ref[...], preferred_element_type=jnp.float32)

    @pl.when(pl.program_id(2) == nk - 1)
    def _():
        y = acc_ref[...] + b_ref[...]
        if apply_act:
            y = jnp.maximum(y, alpha * y)
        o_ref[...] = y.astype(o_ref.dtype)


def _pick_m_tile(Mp):
    for cand in (1024, 512, 256, 128):
        if Mp >= cand and Mp % cand == 0:
            return cand
    # Partial last block possible; rows are independent and the K axis is never split
    # across rows, so out-of-bounds pad rows never feed valid outputs.
    return min(Mp, 512)


def matmul_bias_act(x, w, b, *, apply_act, alpha=0.1, out_dtype=jnp.bfloat16):
    """y = x @ w + b (+ LeakyReLU).  x:(M,K) w:(K,N) b:(N,).  bf16 MXU, f32 acc."""
    M, K = x.shape
    N = w.shape[1]
    x = x.astype(jnp.bfloat16)
    w = w.astype(jnp.bfloat16)

    Mp = _round_up(M, 16)                      # bf16 packs 2 rows per sublane
    Kp = K if K % 8 == 0 else _round_up(K, 128)
    Np = N if N % 8 == 0 else _round_up(N, 128)
    if (Mp, Kp) != (M, K):
        x = jnp.pad(x, ((0, Mp - M), (0, Kp - K)))
    if (Kp, Np) != (K, N):
        w = jnp.pad(w, ((0, Kp - K), (0, Np - N)))
    b2 = jnp.pad(b.astype(jnp.float32), (0, Np - N)).reshape(1, Np)

    tm = _pick_m_tile(Mp)
    if Kp <= 1024:
        tk = Kp
    else:
        tk = Kp
        for cand in (1024, 768, 512, 256, 1152, 384, 128):   # 256-aligned first (v6e/v7x MXU)
            if Kp % cand == 0:
                tk = cand
                break
    nk = Kp // tk
    tn = Np if Np <= 512 else (512 if Np % 512 == 0 else Np)
    # v7x: make sure >=2 parallel blocks exist so both TensorCores get work.
    if _cdiv(Mp, tm) == 1 and Np // tn == 1 and tn % 256 == 0:
        tn //= 2

    if nk == 1:
        kernel = functools.partial(_mm_bias_act_1pass_kernel, alpha=alpha, apply_act=apply_act)
        out = pl.pallas_call(
            kernel,
            out_shape=jax.ShapeDtypeStruct((Mp, Np), out_dtype),
            grid_spec=pltpu.PrefetchScalarGridSpec(
                num_scalar_prefetch=0,
                grid=(pl.cdiv(Mp, tm), Np // tn),
                in_specs=[
                    pl.BlockSpec((tm, tk), lambda i, j: (i, 0)),
                    pl.BlockSpec((tk, tn), lambda i, j: (0, j)),
                    pl.BlockSpec((1, tn), lambda i, j: (0, j)),
                ],
                out_specs=pl.BlockSpec((tm, tn), lambda i, j: (i, j)),
            ),
            compiler_params=pltpu.CompilerParams(
                dimension_semantics=("parallel", "parallel"),
                vmem_limit_bytes=_VMEM_LIMIT),
        )(x, w, b2)
    else:
        kernel = functools.partial(_mm_bias_act_kernel, nk=nk, alpha=alpha, apply_act=apply_act)
        out = pl.pallas_call(
            kernel,
            out_shape=jax.ShapeDtypeStruct((Mp, Np), out_dtype),
            grid_spec=pltpu.PrefetchScalarGridSpec(
                num_scalar_prefetch=0,
                grid=(pl.cdiv(Mp, tm), Np // tn, nk),
                in_specs=[
                    pl.BlockSpec((tm, tk), lambda i, j, k: (i, k)),
                    pl.BlockSpec((tk, tn), lambda i, j, k: (k, j)),
                    pl.BlockSpec((1, tn), lambda i, j, k: (0, j)),
                ],
                out_specs=pl.BlockSpec((tm, tn), lambda i, j, k: (i, j)),
                scratch_shapes=[pltpu.VMEM((tm, tn), jnp.float32)],
            ),
            compiler_params=pltpu.CompilerParams(
                dimension_semantics=("parallel", "parallel", "arbitrary"),
                vmem_limit_bytes=_VMEM_LIMIT),
        )(x, w, b2)
    if (Mp, Np) != (M, N):
        out = out[:M, :N]
    return out


# ----------------------------------------------------------------------------
# Kernel family 2: split-K dual matmul (1x1 conv over a virtual channel concat)
# ----------------------------------------------------------------------------
def _mm_dual_kernel(x1_ref, w1_ref, x2_ref, w2_ref, b_ref, o_ref, *, alpha):
    y = jnp.dot(x1_ref[...], w1_ref[...], preferred_element_type=jnp.float32)
    y = y + jnp.dot(x2_ref[...], w2_ref[...], preferred_element_type=jnp.float32)
    y = y + b_ref[...]
    y = jnp.maximum(y, alpha * y)
    o_ref[...] = y.astype(o_ref.dtype)


def matmul2_bias_act(x1, w1, x2, w2, b, *, alpha=0.1, out_dtype=jnp.bfloat16):
    """y = LeakyReLU(x1 @ w1 + x2 @ w2 + b)  -- concat([x1,x2],-1) never materialised."""
    M, K1 = x1.shape
    K2 = x2.shape[1]
    N = w1.shape[1]
    x1 = x1.astype(jnp.bfloat16)
    x2 = x2.astype(jnp.bfloat16)
    Mp = _round_up(M, 16)
    if Mp != M:
        x1 = jnp.pad(x1, ((0, Mp - M), (0, 0)))
        x2 = jnp.pad(x2, ((0, Mp - M), (0, 0)))
    b2 = b.astype(jnp.float32).reshape(1, N)

    tm = _pick_m_tile(Mp)
    tn = N if N <= 512 else 512
    if _cdiv(Mp, tm) == 1 and N // tn == 1 and tn % 256 == 0:
        tn //= 2

    kernel = functools.partial(_mm_dual_kernel, alpha=alpha)
    out = pl.pallas_call(
        kernel,
        out_shape=jax.ShapeDtypeStruct((Mp, N), out_dtype),
        grid_spec=pltpu.PrefetchScalarGridSpec(
            num_scalar_prefetch=0,
            grid=(pl.cdiv(Mp, tm), N // tn),
            in_specs=[
                pl.BlockSpec((tm, K1), lambda i, j: (i, 0)),
                pl.BlockSpec((K1, tn), lambda i, j: (0, j)),
                pl.BlockSpec((tm, K2), lambda i, j: (i, 0)),
                pl.BlockSpec((K2, tn), lambda i, j: (0, j)),
                pl.BlockSpec((1, tn), lambda i, j: (0, j)),
            ],
            out_specs=pl.BlockSpec((tm, tn), lambda i, j: (i, j)),
        ),
        compiler_params=pltpu.CompilerParams(
            dimension_semantics=("parallel", "parallel"),
            vmem_limit_bytes=_VMEM_LIMIT),
    )(x1, w1.astype(jnp.bfloat16), x2, w2.astype(jnp.bfloat16), b2)
    if Mp != M:
        out = out[:M]
    return out


# ----------------------------------------------------------------------------
# Kernel family 3: generic fused "flat-shift" conv (row-tiled, de-striped output,
# optional fused residual add)
# ----------------------------------------------------------------------------
def _shift_conv_body(x_ref, w_ref, b_ref, r_ref, o_ref, acc_ref,
                     shifts, m_blk, wrow, wout, tr, alpha, act):
    # T MXU matmuls over constant-row-shift windows, accumulated into a f32 VMEM scratch.
    acc_ref[...] = jnp.dot(x_ref[0, 0, pl.ds(shifts[0], m_blk), :], w_ref[0],
                           preferred_element_type=jnp.float32)
    for t in range(1, len(shifts)):
        acc_ref[...] += jnp.dot(x_ref[0, 0, pl.ds(shifts[t], m_blk), :], w_ref[t],
                                preferred_element_type=jnp.float32)
    # Fused epilogue: bias + LeakyReLU (+ residual AFTER the activation, matching
    # x + LeakyReLU(conv(h)+b)), written de-striped: only the `wout` valid columns of
    # each image row are stored, so no XLA slice/reshape pass follows.
    for h in range(tr):
        row = acc_ref[pl.ds(h * wrow, wout), :] + b_ref[...]
        if act:
            row = jnp.maximum(row, alpha * row)
        if r_ref is not None:
            row = row + r_ref[0, h, :, :].astype(jnp.float32)
        o_ref[0, h, :, :] = row.astype(o_ref.dtype)


def _shift_conv_kernel(x_ref, w_ref, b_ref, o_ref, acc_ref, *,
                       shifts, m_blk, wrow, wout, tr, alpha, act):
    _shift_conv_body(x_ref, w_ref, b_ref, None, o_ref, acc_ref,
                     shifts, m_blk, wrow, wout, tr, alpha, act)


def _shift_conv_res_kernel(x_ref, w_ref, b_ref, r_ref, o_ref, acc_ref, *,
                           shifts, m_blk, wrow, wout, tr, alpha, act):
    _shift_conv_body(x_ref, w_ref, b_ref, r_ref, o_ref, acc_ref,
                     shifts, m_blk, wrow, wout, tr, alpha, act)


def _divisor_row_split(Hout, Wrow, halo_rows, K, tc, Wout, has_res, budget):
    """Smallest NR dividing Hout (largest row tile) whose per-block buffers fit `budget`."""
    for NR in range(1, Hout + 1):
        if Hout % NR:
            continue
        TR = Hout // NR
        m_blk = TR * Wrow
        win = (TR + halo_rows) * Wrow
        need = (2 * win * K * 2              # double-buffered bf16 input window
                + m_blk * tc * 4             # f32 accumulator scratch
                + 2 * TR * Wout * tc * 2     # double-buffered bf16 output block
                + (2 * TR * Wout * tc * 2 if has_res else 0))
        if need <= budget:
            return NR, TR
    return Hout, 1


def _shift_conv(x_img, shifts, w_t, b, *, Wrow, Wout, Hout, halo_rows,
                residual=None, act=True, alpha=0.1, out_dtype=jnp.bfloat16,
                row_budget=None):
    """Generic fused conv where each tap is a constant row shift in the flattened
    (rows*Wrow, K) image.  x_img: (N, Hout+halo_rows, Wrow, K), zero-padded so every
    shifted window load stays in bounds.  w_t: (T, K, Cout).  Output (N, Hout, Wout, Cout)."""
    N, Himg, _, K = x_img.shape
    T, _, Cout = w_t.shape
    assert Himg == Hout + halo_rows
    budget = _ROW_BUDGET if row_budget is None else row_budget

    tc = Cout if Cout <= 512 else 512
    NR, TR = _divisor_row_split(Hout, Wrow, halo_rows, K, tc, Wout,
                                residual is not None, budget)
    # v7x: guarantee >=2 parallel grid steps so both TensorCores get work.
    if N * NR * (Cout // tc) == 1 and tc % 256 == 0:
        tc //= 2

    win_rows = TR + halo_rows
    WIN = win_rows * Wrow
    m_blk = TR * Wrow
    if NR == 1:
        xwin = x_img.reshape(N, 1, Himg * Wrow, K)        # free reshape, no copy pass
    else:
        # Duplicate the small row halo per block ONCE in HBM so every grid step's input
        # is a plain Blocked slice: keeps auto double-buffering, bounds VMEM per step.
        ridx = jnp.arange(NR)[:, None] * TR + jnp.arange(win_rows)[None, :]
        xwin = jnp.take(x_img, ridx, axis=1).reshape(N, NR, WIN, K)

    b2 = b.astype(jnp.float32).reshape(1, Cout)
    kw = dict(shifts=tuple(shifts), m_blk=m_blk, wrow=Wrow, wout=Wout,
              tr=TR, alpha=alpha, act=act)

    in_specs = [
        pl.BlockSpec((1, 1, WIN, K), lambda n, r, c: (n, r, 0, 0)),
        pl.BlockSpec((T, K, tc), lambda n, r, c: (0, 0, c)),
        pl.BlockSpec((1, tc), lambda n, r, c: (0, c)),
    ]
    args = [xwin, w_t.astype(jnp.bfloat16), b2]
    if residual is not None:
        in_specs.append(pl.BlockSpec((1, TR, Wout, tc), lambda n, r, c: (n, r, 0, c)))
        args.append(residual)
        kernel = functools.partial(_shift_conv_res_kernel, **kw)
    else:
        kernel = functools.partial(_shift_conv_kernel, **kw)

    out = pl.pallas_call(
        kernel,
        out_shape=jax.ShapeDtypeStruct((N, Hout, Wout, Cout), out_dtype),
        grid_spec=pltpu.PrefetchScalarGridSpec(
            num_scalar_prefetch=0,
            grid=(N, NR, Cout // tc),
            in_specs=in_specs,
            out_specs=pl.BlockSpec((1, TR, Wout, tc), lambda n, r, c: (n, r, 0, c)),
            scratch_shapes=[pltpu.VMEM((m_blk, tc), jnp.float32)],
        ),
        compiler_params=pltpu.CompilerParams(
            dimension_semantics=("parallel", "parallel", "parallel"),
            vmem_limit_bytes=_VMEM_LIMIT),
    )(*args)
    return out


def conv3x3_s1(x, w, b, *, residual=None, act=True, alpha=0.1,
               out_dtype=jnp.bfloat16, row_budget=None):
    """Stride-1 'same' 3x3 conv + bias + LeakyReLU (+ fused residual), no HBM im2col."""
    Nn, H, W, Cin = x.shape
    Cout = w.shape[-1]
    Wp = W + 2
    # rows pad: 1 (top, 'same' padding) + 1 (bottom, 'same') + 1 slack row so every
    # shifted m_blk-row window load stays inside the VMEM block -> halo_rows = 3.
    xp = jnp.pad(x.astype(jnp.bfloat16), ((0, 0), (1, 2), (1, 1), (0, 0)))
    w9 = w.astype(jnp.bfloat16).reshape(9, Cin, Cout)
    shifts = [kh * Wp + kw for kh in range(3) for kw in range(3)]
    return _shift_conv(xp, shifts, w9, b, Wrow=Wp, Wout=W, Hout=H, halo_rows=3,
                       residual=residual, act=act, alpha=alpha, out_dtype=out_dtype,
                       row_budget=row_budget)


def conv3x3_s2(x, w, b, *, act=True, alpha=0.1, out_dtype=jnp.bfloat16, row_budget=None):
    """Stride-2 'same' 3x3 conv: space-to-depth turns it into a stride-1 2x2 conv with
    4*Cin channels (4x deeper MXU contraction, 1x HBM copy instead of 9x im2col)."""
    Nn, H, W, Cin = x.shape
    Cout = w.shape[-1]
    assert H % 2 == 0 and W % 2 == 0
    Hb, Wsd = (H + 2) // 2, (W + 2) // 2
    Ho, Wo = H // 2, W // 2
    xp = jnp.pad(x.astype(jnp.bfloat16), ((0, 0), (1, 1), (1, 1), (0, 0)))
    xsd = xp.reshape(Nn, Hb, 2, Wsd, 2, Cin).transpose(0, 1, 3, 2, 4, 5)
    xsd = xsd.reshape(Nn, Hb, Wsd, 4 * Cin)
    xsd = jnp.pad(xsd, ((0, 0), (0, 1), (0, 0), (0, 0)))    # 1 slack block-row -> halo_rows=2
    # w (3,3,Cin,Cout) -> (2x2 taps, phase-major 4*Cin, Cout); taps outside 3x3 are zero.
    w4 = jnp.pad(w.astype(jnp.bfloat16), ((0, 1), (0, 1), (0, 0), (0, 0)))
    w4 = w4.reshape(2, 2, 2, 2, Cin, Cout).transpose(0, 2, 1, 3, 4, 5)
    w4 = w4.reshape(4, 4 * Cin, Cout)
    shifts = [a * Wsd + bb for a in range(2) for bb in range(2)]
    return _shift_conv(xsd, shifts, w4, b, Wrow=Wsd, Wout=Wo, Hout=Ho, halo_rows=2,
                       act=act, alpha=alpha, out_dtype=out_dtype, row_budget=row_budget)


# ----------------------------------------------------------------------------
# Convolution dispatch
# ----------------------------------------------------------------------------
def conv2d_im2col(x, w, b, *, stride, act, out_dtype=jnp.bfloat16):
    """Im2col + Pallas matmul.  Only used for the first Cin=3 conv (K=27)."""
    N, H, W, Cin = x.shape
    KH, KW, _, Cout = w.shape
    pad = KH // 2
    xp = jnp.pad(x, ((0, 0), (pad, pad), (pad, pad), (0, 0)))
    Ho = (H + 2 * pad - KH) // stride + 1
    Wo = (W + 2 * pad - KW) // stride + 1
    patches = []
    for kh in range(KH):
        for kw in range(KW):
            patches.append(
                xp[:, kh:kh + stride * Ho:stride, kw:kw + stride * Wo:stride, :])
    pat = patches[0] if len(patches) == 1 else jnp.concatenate(patches, axis=-1)
    x2d = pat.reshape(N * Ho * Wo, KH * KW * Cin)
    w2d = w.reshape(KH * KW * Cin, Cout)
    y2d = matmul_bias_act(x2d, w2d, b, apply_act=act, out_dtype=out_dtype)
    return y2d.reshape(N, Ho, Wo, Cout)


def conv2d(x, p, *, stride=1, act=True, out_dtype=jnp.bfloat16, residual=None):
    w, b = p["w"], p["b"]
    k = w.shape[0]
    Cin = w.shape[2]
    Nn, H, W, _ = x.shape
    if k == 1 and stride == 1:
        assert residual is None
        Cout = w.shape[-1]
        y = matmul_bias_act(x.reshape(Nn * H * W, Cin), w.reshape(Cin, Cout), b,
                            apply_act=act, out_dtype=out_dtype)
        return y.reshape(Nn, H, W, Cout)
    if k == 3 and stride == 1 and Cin >= 8:
        return conv3x3_s1(x, w, b, residual=residual, act=act, out_dtype=out_dtype)
    if k == 3 and stride == 2 and Cin >= 8 and H % 2 == 0 and W % 2 == 0:
        assert residual is None
        return conv3x3_s2(x, w, b, act=act, out_dtype=out_dtype)
    assert residual is None
    return conv2d_im2col(x, w, b, stride=stride, act=act, out_dtype=out_dtype)


def _concat_conv1x1(xa, xb, p, alpha=0.1):
    """1x1 conv + LeakyReLU over concat([xa, xb], channels) without the concat."""
    Nn, H, W, Ca = xa.shape
    Cb = xb.shape[-1]
    Cout = p["w"].shape[-1]
    w = p["w"].reshape(Ca + Cb, Cout)
    y = matmul2_bias_act(xa.reshape(Nn * H * W, Ca), w[:Ca],
                         xb.reshape(Nn * H * W, Cb), w[Ca:], p["b"], alpha=alpha)
    return y.reshape(Nn, H, W, Cout)


def upsample_nearest_2x(x):
    # nn.UpsamplingNearest2d(scale_factor=2) -- pure data movement glue.
    return jnp.repeat(jnp.repeat(x, 2, axis=1), 2, axis=2)


# ----------------------------------------------------------------------------
# Deterministic parameter construction (weights pre-cast to bf16 once)
# ----------------------------------------------------------------------------
class _KeyGen:
    def __init__(self, seed=0):
        self._key = jax.random.PRNGKey(seed)

    def __call__(self):
        self._key, sub = jax.random.split(self._key)
        return sub


def _conv_p(kg, cin, cout, k):
    fan_in = k * k * cin
    w = jax.random.normal(kg(), (k, k, cin, cout), jnp.float32) * (2.0 / fan_in) ** 0.5
    b = jax.random.normal(kg(), (cout,), jnp.float32) * 0.01
    return {"w": w.astype(jnp.bfloat16), "b": b}


# Darknet53 plan: ("conv", cin, cout, kernel, stride) | ("res", channels, repeats)
# | ("route", name)
_DARKNET_CFG = [
    ("conv", 3, 32, 3, 1),
    ("conv", 32, 64, 3, 2),
    ("res", 64, 1),
    ("conv", 64, 128, 3, 2),
    ("res", 128, 2),
    ("conv", 128, 256, 3, 2),
    ("res", 256, 8),
    ("route", "conv26"),
    ("conv", 256, 512, 3, 2),
    ("res", 512, 8),
    ("route", "conv43"),
    ("conv", 512, 1024, 3, 2),
    ("res", 1024, 4),
    ("route", "conv52"),
]


def build_darknet_params(kg):
    plist = []
    for item in _DARKNET_CFG:
        if item[0] == "conv":
            _, cin, cout, k, _s = item
            plist.append(_conv_p(kg, cin, cout, k))
        elif item[0] == "res":
            _, c, n = item
            for _ in range(n):
                plist.append(_conv_p(kg, c, c // 2, 1))
                plist.append(_conv_p(kg, c // 2, c, 3))
    return plist


def build_yolo_params(num_anchors, num_classes, seed=0):
    kg = _KeyGen(seed)
    head_out = num_anchors * (5 + num_classes)
    p = {}
    p["backbone"] = build_darknet_params(kg)
    p["layer1"] = [_conv_p(kg, 1024, 512, 1), _conv_p(kg, 512, 1024, 3),
                   _conv_p(kg, 1024, 512, 1), _conv_p(kg, 512, 1024, 3),
                   _conv_p(kg, 1024, 512, 1)]
    p["stage1"] = [_conv_p(kg, 512, 1024, 3), _conv_p(kg, 1024, head_out, 1)]
    p["upsample1"] = [_conv_p(kg, 512, 256, 1)]
    p["layer2"] = [_conv_p(kg, 768, 256, 1), _conv_p(kg, 256, 512, 3),
                   _conv_p(kg, 512, 256, 1), _conv_p(kg, 256, 512, 3),
                   _conv_p(kg, 512, 256, 1)]
    p["stage2"] = [_conv_p(kg, 256, 512, 3), _conv_p(kg, 512, head_out, 1)]
    p["upsample2"] = [_conv_p(kg, 256, 128, 1)]
    p["layer3"] = [_conv_p(kg, 384, 128, 1), _conv_p(kg, 128, 256, 3),
                   _conv_p(kg, 256, 128, 1), _conv_p(kg, 128, 256, 3),
                   _conv_p(kg, 256, 128, 1)]
    p["stage3"] = [_conv_p(kg, 128, 256, 3), _conv_p(kg, 256, head_out, 1)]
    return p


# ----------------------------------------------------------------------------
# Forward pass
# ----------------------------------------------------------------------------
def darknet53_forward(x, plist):
    it = iter(plist)
    routes = {}
    for item in _DARKNET_CFG:
        if item[0] == "conv":
            stride = item[4]
            x = conv2d(x, next(it), stride=stride, act=True)
        elif item[0] == "res":
            for _ in range(item[2]):
                p1 = next(it)
                p2 = next(it)
                h = conv2d(x, p1, stride=1, act=True)                   # 1x1 reduce
                # fused 3x3 + bias + LeakyReLU + residual add (x never re-read by XLA)
                x = conv2d(h, p2, stride=1, act=True, residual=x)
        else:
            routes[item[1]] = x
    return routes["conv26"], routes["conv43"], routes["conv52"]


def _seq(x, plist, last_act=True, last_f32=False):
    for i, p in enumerate(plist):
        last = i == len(plist) - 1
        x = conv2d(x, p, stride=1,
                   act=(last_act if last else True),
                   out_dtype=(jnp.float32 if (last and last_f32) else jnp.bfloat16))
    return x


def yolov3_forward(x_nchw, params, *, num_anchors, num_classes, input_size):
    # PyTorch NCHW input -> NHWC bf16 for the kernel layout.
    x = jnp.transpose(x_nchw, (0, 2, 3, 1)).astype(jnp.bfloat16)
    B = x.shape[0]
    coord = 5 + num_classes

    conv26, conv43, conv52 = darknet53_forward(x, params["backbone"])

    layer1_out = _seq(conv52, params["layer1"])
    stage1_out = _seq(layer1_out, params["stage1"], last_act=False, last_f32=True)
    up1 = upsample_nearest_2x(_seq(layer1_out, params["upsample1"]))
    # first conv of layer2 consumes concat([up1, conv43]) via split-K (no concat in HBM)
    l2 = _concat_conv1x1(up1, conv43, params["layer2"][0])
    layer2_out = _seq(l2, params["layer2"][1:])
    stage2_out = _seq(layer2_out, params["stage2"], last_act=False, last_f32=True)
    up2 = upsample_nearest_2x(_seq(layer2_out, params["upsample2"]))
    l3 = _concat_conv1x1(up2, conv26, params["layer3"][0])
    layer3_out = _seq(l3, params["layer3"][1:])
    stage3_out = _seq(layer3_out, params["stage3"], last_act=False, last_f32=True)

    gl = input_size // 32
    gm = input_size // 16
    gs = input_size // 8
    # Outputs are already NHWC, so PyTorch's permute(0,2,3,1)+view is a pure reshape;
    # the reference's per-field slice + concat along the last dim is an identity.
    large_scale = stage1_out.reshape(B, gl, gl, num_anchors, coord)
    medium_scale = stage2_out.reshape(B, gm, gm, num_anchors, coord)
    small_scale = stage3_out.reshape(B, gs, gs, num_anchors, coord)
    return large_scale, medium_scale, small_scale


# ----------------------------------------------------------------------------
# Lightweight self-check of the fused conv kernels (exercises the row-tiled path)
# ----------------------------------------------------------------------------
def _ref_conv(x, w, b, *, stride, act=True, residual=None, alpha=0.1):
    q = lambda a: a.astype(jnp.bfloat16).astype(jnp.float32)
    y = lax.conv_general_dilated(q(x), q(w), (stride, stride),
                                 padding=((1, 1), (1, 1)),
                                 dimension_numbers=("NHWC", "HWIO", "NHWC"))
    y = y + b.astype(jnp.float32)
    if act:
        y = jnp.maximum(y, alpha * y)
    if residual is not None:
        y = y + q(residual)
    return y


def _self_check():
    kg = _KeyGen(7)
    x = jax.random.normal(kg(), (1, 12, 12, 32), jnp.float32)
    res = jax.random.normal(kg(), (1, 12, 12, 64), jnp.float32)
    p = _conv_p(kg, 32, 64, 3)
    # tiny row budget -> forces the multi-row-block (halo window) path
    got = conv3x3_s1(x.astype(jnp.bfloat16), p["w"], p["b"],
                     residual=res.astype(jnp.bfloat16), act=True, row_budget=24 * 1024)
    want = _ref_conv(x, p["w"].astype(jnp.float32), p["b"], stride=1, residual=res)
    assert jnp.allclose(got.astype(jnp.float32), want, atol=3e-2, rtol=3e-2), \
        "conv3x3_s1 self-check mismatch"

    p2 = _conv_p(kg, 32, 64, 3)
    got2 = conv3x3_s2(x.astype(jnp.bfloat16), p2["w"], p2["b"], act=True,
                      row_budget=24 * 1024)
    want2 = _ref_conv(x, p2["w"].astype(jnp.float32), p2["b"], stride=2)
    assert jnp.allclose(got2.astype(jnp.float32), want2, atol=3e-2, rtol=3e-2), \
        "conv3x3_s2 self-check mismatch"


# ----------------------------------------------------------------------------
if __name__ == "__main__":
    _self_check()

    INPUT_SIZE = 32          # smallest size compatible with /32 downsampling
    NUM_CLASSES = 2
    ANCHORS = [(10, 13), (16, 30), (33, 23)]
    NUM_ANCHORS = len(ANCHORS)
    BATCH = 2

    params = build_yolo_params(NUM_ANCHORS, NUM_CLASSES, seed=0)
    x = jax.random.normal(
        jax.random.PRNGKey(0), (BATCH, 3, INPUT_SIZE, INPUT_SIZE), jnp.float32)

    fwd = jax.jit(functools.partial(
        yolov3_forward,
        num_anchors=NUM_ANCHORS,
        num_classes=NUM_CLASSES,
        input_size=INPUT_SIZE))

    large, medium, small = fwd(x, params)
    jax.block_until_ready((large, medium, small))

    coord = 5 + NUM_CLASSES
    assert large.shape == (BATCH, INPUT_SIZE // 32, INPUT_SIZE // 32, NUM_ANCHORS, coord)
    assert medium.shape == (BATCH, INPUT_SIZE // 16, INPUT_SIZE // 16, NUM_ANCHORS, coord)
    assert small.shape == (BATCH, INPUT_SIZE // 8, INPUT_SIZE // 8, NUM_ANCHORS, coord)
    assert jnp.all(jnp.isfinite(large))
    assert jnp.all(jnp.isfinite(medium))
    assert jnp.all(jnp.isfinite(small))
    print("KERNEL_OK")
</pallas_src>

<mosaic_0001>
module attributes {stable_mosaic.version = 11 : i64} {
  func.func @_shift_conv_res_kernel(%arg0: i32, %arg1: i32, %arg2: i32, %arg3: memref<1x1x56x32xbf16, #tpu.memory_space<vmem>>, %arg4: memref<9x32x64xbf16, #tpu.memory_space<vmem>>, %arg5: memref<1x64xf32, #tpu.memory_space<vmem>>, %arg6: memref<1x1x12x64xbf16, #tpu.memory_space<vmem>>, %arg7: memref<1x1x12x64xbf16, #tpu.memory_space<vmem>>, %arg8: memref<14x64xf32, #tpu.memory_space<vmem>>) attributes {dimension_semantics = [#tpu.dimension_semantics<parallel>, #tpu.dimension_semantics<parallel>, #tpu.dimension_semantics<parallel>], iteration_bounds = array<i64: 1, 12, 1>, scalar_prefetch = 0 : i64, scratch_operands = 1 : i64, tpu.core_type = #tpu.core_type<tc>, window_params = [{transform_indices = @transform_0, window_bounds = array<i64: 1, 1, 56, 32>}, {transform_indices = @transform_1, window_bounds = array<i64: 9, 32, 64>}, {transform_indices = @transform_2, window_bounds = array<i64: 1, 64>}, {transform_indices = @transform_3, window_bounds = array<i64: 1, 1, 12, 64>}, {transform_indices = @transform_4, window_bounds = array<i64: 1, 1, 12, 64>}]} {
    %c0 = arith.constant 0 : index
    %c0_0 = arith.constant 0 : index
    %c0_1 = arith.constant 0 : index
    %c0_2 = arith.constant 0 : index
    %0 = vector.load %arg3[%c0, %c0_0, %c0_1, %c0_2] : memref<1x1x56x32xbf16, #tpu.memory_space<vmem>>, vector<1x1x14x32xbf16>
    %1 = vector.shape_cast %0 : vector<1x1x14x32xbf16> to vector<14x32xbf16>
    %c0_3 = arith.constant 0 : index
    %c0_4 = arith.constant 0 : index
    %c0_5 = arith.constant 0 : index
    %2 = vector.load %arg4[%c0_3, %c0_4, %c0_5] : memref<9x32x64xbf16, #tpu.memory_space<vmem>>, vector<1x32x64xbf16>
    %3 = vector.shape_cast %2 : vector<1x32x64xbf16> to vector<32x64xbf16>
    %cst = arith.constant dense<0.000000e+00> : vector<14x64xf32>
    %4 = tpu.matmul %1, %3, %cst {dimension_numbers = #tpu.dot_dimension_numbers<[1], [0], [0], [1], [0, 0, 1, 1], [], []>} : vector<14x32xbf16>, vector<32x64xbf16>, vector<14x64xf32> -> vector<14x64xf32>
    %c0_6 = arith.constant 0 : index
    %c0_7 = arith.constant 0 : index
    %5 = vector.load %arg8[%c0_6, %c0_7] : memref<14x64xf32, #tpu.memory_space<vmem>>, vector<14x64xf32>
    tpu.vector_store %arg8[%c0_6, %c0_7], %4 {strides = array<i32>} : memref<14x64xf32, #tpu.memory_space<vmem>>, vector<14x64xf32>,
    %c0_8 = arith.constant 0 : index
    %c0_9 = arith.constant 0 : index
    %6 = vector.load %arg8[%c0_8, %c0_9] : memref<14x64xf32, #tpu.memory_space<vmem>>, vector<14x64xf32>
    %c0_10 = arith.constant 0 : index
    %c0_11 = arith.constant 0 : index
    %c1 = arith.constant 1 : index
    %c0_12 = arith.constant 0 : index
    %7 = vector.load %arg3[%c0_10, %c0_11, %c1, %c0_12] : memref<1x1x56x32xbf16, #tpu.memory_space<vmem>>, vector<1x1x14x32xbf16>
    %8 = vector.shape_cast %7 : vector<1x1x14x32xbf16> to vector<14x32xbf16>
    %c1_13 = arith.constant 1 : index
    %c0_14 = arith.constant 0 : index
    %c0_15 = arith.constant 0 : index
    %9 = vector.load %arg4[%c1_13, %c0_14, %c0_15] : memref<9x32x64xbf16, #tpu.memory_space<vmem>>, vector<1x32x64xbf16>
    %10 = vector.shape_cast %9 : vector<1x32x64xbf16> to vector<32x64xbf16>
    %cst_16 = arith.constant dense<0.000000e+00> : vector<14x64xf32>
    %11 = tpu.matmul %8, %10, %cst_16 {dimension_numbers = #tpu.dot_dimension_numbers<[1], [0], [0], [1], [0, 0, 1, 1], [], []>} : vector<14x32xbf16>, vector<32x64xbf16>, vector<14x64xf32> -> vector<14x64xf32>
    %12 = arith.addf %6, %11 : vector<14x64xf32>
    %c0_17 = arith.constant 0 : index
    %c0_18 = arith.constant 0 : index
    %13 = vector.load %arg8[%c0_17, %c0_18] : memref<14x64xf32, #tpu.memory_space<vmem>>, vector<14x64xf32>
    tpu.vector_store %arg8[%c0_17, %c0_18], %12 {strides = array<i32>} : memref<14x64xf32, #tpu.memory_space<vmem>>, vector<14x64xf32>,
    %c0_19 = arith.constant 0 : index
    %c0_20 = arith.constant 0 : index
    %14 = vector.load %arg8[%c0_19, %c0_20] : memref<14x64xf32, #tpu.memory_space<vmem>>, vector<14x64xf32>
    %c0_21 = arith.constant 0 : index
    %c0_22 = arith.constant 0 : index
    %c2 = arith.constant 2 : index
    %c0_23 = arith.constant 0 : index
    %15 = vector.load %arg3[%c0_21, %c0_22, %c2, %c0_23] : memref<1x1x56x32xbf16, #tpu.memory_space<vmem>>, vector<1x1x14x32xbf16>
    %16 = vector.shape_cast %15 : vector<1x1x14x32xbf16> to vector<14x32xbf16>
    %c2_24 = arith.constant 2 : index
    %c0_25 = arith.constant 0 : index
    %c0_26 = arith.constant 0 : index
    %17 = vector.load %arg4[%c2_24, %c0_25, %c0_26] : memref<9x32x64xbf16, #tpu.memory_space<vmem>>, vector<1x32x64xbf16>
    %18 = vector.shape_cast %17 : vector<1x32x64xbf16> to vector<32x64xbf16>
    %cst_27 = arith.constant dense<0.000000e+00> : vector<14x64xf32>
    %19 = tpu.matmul %16, %18, %cst_27 {dimension_numbers = #tpu.dot_dimension_numbers<[1], [0], [0], [1], [0, 0, 1, 1], [], []>} : vector<14x32xbf16>, vector<32x64xbf16>, vector<14x64xf32> -> vector<14x64xf32>
    %20 = arith.addf %14, %19 : vector<14x64xf32>
    %c0_28 = arith.constant 0 : index
    %c0_29 = arith.constant 0 : index
    %21 = vector.load %arg8[%c0_28, %c0_29] : memref<14x64xf32, #tpu.memory_space<vmem>>, vector<14x64xf32>
    tpu.vector_store %arg8[%c0_28, %c0_29], %20 {strides = array<i32>} : memref<14x64xf32, #tpu.memory_space<vmem>>, vector<14x64xf32>,
    %c0_30 = arith.constant 0 : index
    %c0_31 = arith.constant 0 : index
    %22 = vector.load %arg8[%c0_30, %c0_31] : memref<14x64xf32, #tpu.memory_space<vmem>>, vector<14x64xf32>
    %c0_32 = arith.constant 0 : index
    %c0_33 = arith.constant 0 : index
    %c14 = arith.constant 14 : index
    %c0_34 = arith.constant 0 : index
    %23 = vector.load %arg3[%c0_32, %c0_33, %c14, %c0_34] : memref<1x1x56x32xbf16, #tpu.memory_space<vmem>>, vector<1x1x14x32xbf16>
    %24 = vector.shape_cast %23 : vector<1x1x14x32xbf16> to vector<14x32xbf16>
    %c3 = arith.constant 3 : index
    %c0_35 = arith.constant 0 : index
    %c0_36 = arith.constant 0 : index
    %25 = vector.load %arg4[%c3, %c0_35, %c0_36] : memref<9x32x64xbf16, #tpu.memory_space<vmem>>, vector<1x32x64xbf16>
    %26 = vector.shape_cast %25 : vector<1x32x64xbf16> to vector<32x64xbf16>
    %cst_37 = arith.constant dense<0.000000e+00> : vector<14x64xf32>
    %27 = tpu.matmul %24, %26, %cst_37 {dimension_numbers = #tpu.dot_dimension_numbers<[1], [0], [0], [1], [0, 0, 1, 1], [], []>} : vector<14x32xbf16>, vector<32x64xbf16>, vector<14x64xf32> -> vector<14x64xf32>
    %28 = arith.addf %22, %27 : vector<14x64xf32>
    %c0_38 = arith.constant 0 : index
    %c0_39 = arith.constant 0 : index
    %29 = vector.load %arg8[%c0_38, %c0_39] : memref<14x64xf32, #tpu.memory_space<vmem>>, vector<14x64xf32>
    tpu.vector_store %arg8[%c0_38, %c0_39], %28 {strides = array<i32>} : memref<14x64xf32, #tpu.memory_space<vmem>>, vector<14x64xf32>,
    %c0_40 = arith.constant 0 : index
    %c0_41 = arith.constant 0 : index
    %30 = vector.load %arg8[%c0_40, %c0_41] : memref<14x64xf32, #tpu.memory_space<vmem>>, vector<14x64xf32>
    %c0_42 = arith.constant 0 : index
    %c0_43 = arith.constant 0 : index
    %c15 = arith.constant 15 : index
    %c0_44 = arith.constant 0 : index
    %31 = vector.load %arg3[%c0_42, %c0_43, %c15, %c0_44] : memref<1x1x56x32xbf16, #tpu.memory_space<vmem>>, vector<1x1x14x32xbf16>
    %32 = vector.shape_cast %31 : vector<1x1x14x32xbf16> to vector<14x32xbf16>
    %c4 = arith.constant 4 : index
    %c0_45 = arith.constant 0 : index
    %c0_46 = arith.constant 0 : index
    %33 = vector.load %arg4[%c4, %c0_45, %c0_46] : memref<9x32x64xbf16, #tpu.memory_space<vmem>>, vector<1x32x64xbf16>
    %34 = vector.shape_cast %33 : vector<1x32x64xbf16> to vector<32x64xbf16>
    %cst_47 = arith.constant dense<0.000000e+00> : vector<14x64xf32>
    %35 = tpu.matmul %32, %34, %cst_47 {dimension_numbers = #tpu.dot_dimension_numbers<[1], [0], [0], [1], [0, 0, 1, 1], [], []>} : vector<14x32xbf16>, vector<32x64xbf16>, vector<14x64xf32> -> vector<14x64xf32>
    %36 = arith.addf %30, %35 : vector<14x64xf32>
    %c0_48 = arith.constant 0 : index
    %c0_49 = arith.constant 0 : index
    %37 = vector.load %arg8[%c0_48, %c0_49] : memref<14x64xf32, #tpu.memory_space<vmem>>, vector<14x64xf32>
    tpu.vector_store %arg8[%c0_48, %c0_49], %36 {strides = array<i32>} : memref<14x64xf32, #tpu.memory_space<vmem>>, vector<14x64xf32>,
    %c0_50 = arith.constant 0 : index
    %c0_51 = arith.constant 0 : index
    %38 = vector.load %arg8[%c0_50, %c0_51] : memref<14x64xf32, #tpu.memory_space<vmem>>, vector<14x64xf32>
    %c0_52 = arith.constant 0 : index
    %c0_53 = arith.constant 0 : index
    %c16 = arith.constant 16 : index
    %c0_54 = arith.constant 0 : index
    %39 = vector.load %arg3[%c0_52, %c0_53, %c16, %c0_54] : memref<1x1x56x32xbf16, #tpu.memory_space<vmem>>, vector<1x1x14x32xbf16>
    %40 = vector.shape_cast %39 : vector<1x1x14x32xbf16> to vector<14x32xbf16>
    %c5 = arith.constant 5 : index
    %c0_55 = arith.constant 0 : index
    %c0_56 = arith.constant 0 : index
    %41 = vector.load %arg4[%c5, %c0_55, %c0_56] : memref<9x32x64xbf16, #tpu.memory_space<vmem>>, vector<1x32x64xbf16>
    %42 = vector.shape_cast %41 : vector<1x32x64xbf16> to vector<32x64xbf16>
    %cst_57 = arith.constant dense<0.000000e+00> : vector<14x64xf32>
    %43 = tpu.matmul %40, %42, %cst_57 {dimension_numbers = #tpu.dot_dimension_numbers<[1], [0], [0], [1], [0, 0, 1, 1], [], []>} : vector<14x32xbf16>, vector<32x64xbf16>, vector<14x64xf32> -> vector<14x64xf32>
    %44 = arith.addf %38, %43 : vector<14x64xf32>
    %c0_58 = arith.constant 0 : index
    %c0_59 = arith.constant 0 : index
    %45 = vector.load %arg8[%c0_58, %c0_59] : memref<14x64xf32, #tpu.memory_space<vmem>>, vector<14x64xf32>
    tpu.vector_store %arg8[%c0_58, %c0_59], %44 {strides = array<i32>} : memref<14x64xf32, #tpu.memory_space<vmem>>, vector<14x64xf32>,
    %c0_60 = arith.constant 0 : index
    %c0_61 = arith.constant 0 : index
    %46 = vector.load %arg8[%c0_60, %c0_61] : memref<14x64xf32, #tpu.memory_space<vmem>>, vector<14x64xf32>
    %c0_62 = arith.constant 0 : index
    %c0_63 = arith.constant 0 : index
    %c28 = arith.constant 28 : index
    %c0_64 = arith.constant 0 : index
    %47 = vector.load %arg3[%c0_62, %c0_63, %c28, %c0_64] : memref<1x1x56x32xbf16, #tpu.memory_space<vmem>>, vector<1x1x14x32xbf16>
    %48 = vector.shape_cast %47 : vector<1x1x14x32xbf16> to vector<14x32xbf16>
    %c6 = arith.constant 6 : index
    %c0_65 = arith.constant 0 : index
    %c0_66 = arith.constant 0 : index
    %49 = vector.load %arg4[%c6, %c0_65, %c0_66] : memref<9x32x64xbf16, #tpu.memory_space<vmem>>, vector<1x32x64xbf16>
    %50 = vector.shape_cast %49 : vector<1x32x64xbf16> to vector<32x64xbf16>
    %cst_67 = arith.constant dense<0.000000e+00> : vector<14x64xf32>
    %51 = tpu.matmul %48, %50, %cst_67 {dimension_numbers = #tpu.dot_dimension_numbers<[1], [0], [0], [1], [0, 0, 1, 1], [], []>} : vector<14x32xbf16>, vector<32x64xbf16>, vector<14x64xf32> -> vector<14x64xf32>
    %52 = arith.addf %46, %51 : vector<14x64xf32>
    %c0_68 = arith.constant 0 : index
    %c0_69 = arith.constant 0 : index
    %53 = vector.load %arg8[%c0_68, %c0_69] : memref<14x64xf32, #tpu.memory_space<vmem>>, vector<14x64xf32>
    tpu.vector_store %arg8[%c0_68, %c0_69], %52 {strides = array<i32>} : memref<14x64xf32, #tpu.memory_space<vmem>>, vector<14x64xf32>,
    %c0_70 = arith.constant 0 : index
    %c0_71 = arith.constant 0 : index
    %54 = vector.load %arg8[%c0_70, %c0_71] : memref<14x64xf32, #tpu.memory_space<vmem>>, vector<14x64xf32>
    %c0_72 = arith.constant 0 : index
    %c0_73 = arith.constant 0 : index
    %c29 = arith.constant 29 : index
    %c0_74 = arith.constant 0 : index
    %55 = vector.load %arg3[%c0_72, %c0_73, %c29, %c0_74] : memref<1x1x56x32xbf16, #tpu.memory_space<vmem>>, vector<1x1x14x32xbf16>
    %56 = vector.shape_cast %55 : vector<1x1x14x32xbf16> to vector<14x32xbf16>
    %c7 = arith.constant 7 : index
    %c0_75 = arith.constant 0 : index
    %c0_76 = arith.constant 0 : index
    %57 = vector.load %arg4[%c7, %c0_75, %c0_76] : memref<9x32x64xbf16, #tpu.memory_space<vmem>>, vector<1x32x64xbf16>
    %58 = vector.shape_cast %57 : vector<1x32x64xbf16> to vector<32x64xbf16>
    %cst_77 = arith.constant dense<0.000000e+00> : vector<14x64xf32>
    %59 = tpu.matmul %56, %58, %cst_77 {dimension_numbers = #tpu.dot_dimension_numbers<[1], [0], [0], [1], [0, 0, 1, 1], [], []>} : vector<14x32xbf16>, vector<32x64xbf16>, vector<14x64xf32> -> vector<14x64xf32>
    %60 = arith.addf %54, %59 : vector<14x64xf32>
    %c0_78 = arith.constant 0 : index
    %c0_79 = arith.constant 0 : index
    %61 = vector.load %arg8[%c0_78, %c0_79] : memref<14x64xf32, #tpu.memory_space<vmem>>, vector<14x64xf32>
    tpu.vector_store %arg8[%c0_78, %c0_79], %60 {strides = array<i32>} : memref<14x64xf32, #tpu.memory_space<vmem>>, vector<14x64xf32>,
    %c0_80 = arith.constant 0 : index
    %c0_81 = arith.constant 0 : index
    %62 = vector.load %arg8[%c0_80, %c0_81] : memref<14x64xf32, #tpu.memory_space<vmem>>, vector<14x64xf32>
    %c0_82 = arith.constant 0 : index
    %c0_83 = arith.constant 0 : index
    %c30 = arith.constant 30 : index
    %c0_84 = arith.constant 0 : index
    %63 = vector.load %arg3[%c0_82, %c0_83, %c30, %c0_84] : memref<1x1x56x32xbf16, #tpu.memory_space<vmem>>, vector<1x1x14x32xbf16>
    %64 = vector.shape_cast %63 : vector<1x1x14x32xbf16> to vector<14x32xbf16>
    %c8 = arith.constant 8 : index
    %c0_85 = arith.constant 0 : index
    %c0_86 = arith.constant 0 : index
    %65 = vector.load %arg4[%c8, %c0_85, %c0_86] : memref<9x32x64xbf16, #tpu.memory_space<vmem>>, vector<1x32x64xbf16>
    %66 = vector.shape_cast %65 : vector<1x32x64xbf16> to vector<32x64xbf16>
    %cst_87 = arith.constant dense<0.000000e+00> : vector<14x64xf32>
    %67 = tpu.matmul %64, %66, %cst_87 {dimension_numbers = #tpu.dot_dimension_numbers<[1], [0], [0], [1], [0, 0, 1, 1], [], []>} : vector<14x32xbf16>, vector<32x64xbf16>, vector<14x64xf32> -> vector<14x64xf32>
    %68 = arith.addf %62, %67 : vector<14x64xf32>
    %c0_88 = arith.constant 0 : index
    %c0_89 = arith.constant 0 : index
    %69 = vector.load %arg8[%c0_88, %c0_89] : memref<14x64xf32, #tpu.memory_space<vmem>>, vector<14x64xf32>
    tpu.vector_store %arg8[%c0_88, %c0_89], %68 {strides = array<i32>} : memref<14x64xf32, #tpu.memory_space<vmem>>, vector<14x64xf32>,
    %c0_90 = arith.constant 0 : index
    %c0_91 = arith.constant 0 : index
    %70 = vector.load %arg8[%c0_90, %c0_91] : memref<14x64xf32, #tpu.memory_space<vmem>>, vector<12x64xf32>
    %c0_92 = arith.constant 0 : index
    %c0_93 = arith.constant 0 : index
    %71 = vector.load %arg5[%c0_92, %c0_93] : memref<1x64xf32, #tpu.memory_space<vmem>>, vector<1x64xf32>
    %72 = vector.broadcast %71 : vector<1x64xf32> to vector<12x64xf32>
    %73 = arith.addf %70, %72 : vector<12x64xf32>
    %cst_94 = arith.constant 1.000000e-01 : f32
    %74 = vector.broadcast %cst_94 : f32 to vector<12x64xf32>
    %75 = arith.mulf %74, %73 : vector<12x64xf32>
    %76 = arith.maximumf %73, %75 : vector<12x64xf32>
    %c0_95 = arith.constant 0 : index
    %c0_96 = arith.constant 0 : index
    %c0_97 = arith.constant 0 : index
    %c0_98 = arith.constant 0 : index
    %77 = vector.load %arg6[%c0_95, %c0_96, %c0_97, %c0_98] : memref<1x1x12x64xbf16, #tpu.memory_space<vmem>>, vector<1x1x12x64xbf16>
    %78 = vector.shape_cast %77 : vector<1x1x12x64xbf16> to vector<12x64xbf16>
    %79 = arith.extf %78 : vector<12x64xbf16> to vector<12x64xf32>
    %80 = arith.addf %76, %79 : vector<12x64xf32>
    %81 = arith.truncf %80 : vector<12x64xf32> to vector<12x64xbf16>
    %c0_99 = arith.constant 0 : index
    %c0_100 = arith.constant 0 : index
    %c0_101 = arith.constant 0 : index
    %c0_102 = arith.constant 0 : index
    %82 = vector.load %arg7[%c0_99, %c0_100, %c0_101, %c0_102] : memref<1x1x12x64xbf16, #tpu.memory_space<vmem>>, vector<1x1x12x64xbf16>
    %83 = vector.shape_cast %82 : vector<1x1x12x64xbf16> to vector<12x64xbf16>
    %84 = vector.shape_cast %81 : vector<12x64xbf16> to vector<1x1x12x64xbf16>
    tpu.vector_store %arg7[%c0_99, %c0_100, %c0_101, %c0_102], %84 {strides = array<i32>} : memref<1x1x12x64xbf16, #tpu.memory_space<vmem>>, vector<1x1x12x64xbf16>,
    return
  }
  func.func @transform_0(%arg0: i32, %arg1: i32, %arg2: i32) -> (i32, i32, i32, i32) {
    %c0_i32 = arith.constant 0 : i32
    %c0_i32_0 = arith.constant 0 : i32
    %c0_i32_1 = arith.constant 0 : i32
    return %arg0, %arg1, %c0_i32, %c0_i32_0 : i32, i32, i32, i32
  }
  func.func @transform_1(%arg0: i32, %arg1: i32, %arg2: i32) -> (i32, i32, i32) {
    %c0_i32 = arith.constant 0 : i32
    %c0_i32_0 = arith.constant 0 : i32
    %c0_i32_1 = arith.constant 0 : i32
    return %c0_i32, %c0_i32_0, %arg2 : i32, i32, i32
  }
  func.func @transform_2(%arg0: i32, %arg1: i32, %arg2: i32) -> (i32, i32) {
    %c0_i32 = arith.constant 0 : i32
    %c0_i32_0 = arith.constant 0 : i32
    return %c0_i32, %arg2 : i32, i32
  }
  func.func @transform_3(%arg0: i32, %arg1: i32, %arg2: i32) -> (i32, i32, i32, i32) {
    %c0_i32 = arith.constant 0 : i32
    %c0_i32_0 = arith.constant 0 : i32
    return %arg0, %arg1, %c0_i32, %arg2 : i32, i32, i32, i32
  }
  func.func @transform_4(%arg0: i32, %arg1: i32, %arg2: i32) -> (i32, i32, i32, i32) {
    %c0_i32 = arith.constant 0 : i32
    %c0_i32_0 = arith.constant 0 : i32
    return %arg0, %arg1, %c0_i32, %arg2 : i32, i32, i32, i32
  }
}

</mosaic_0001>

<bundles_post_ra>
// kernel: tpu_custom_call.1
= control target key start
LH: loop header
LB: loop body
LE: loop exit
PB: predicated region body
PF: predicated region fallthrough
CT: control target
= control target key end

     0   :  { %s2204_s0 = inlined_call_operand.hbm [shape: bf16[1,12,56,32], index: 0, kind: input, shape index: {}]   ;;  %s2205_s1 = inlined_call_operand.hbm [shape: bf16[9,32,64], index: 1, kind: input, shape index: {}]   ;;  %s2206_s2 = inlined_call_operand.hbm [shape: f32[1,64], index: 2, kind: input, shape index: {}]   ;;  %s2207_s3 = inlined_call_operand.hbm [shape: bf16[1,12,12,64], index: 3, kind: input, shape index: {}]   ;;  %s2208_s4 = inlined_call_operand.hbm [shape: bf16[1,12,12,64], index: 4, kind: output, shape index: {}]  }
   0x1   :  { %2215 = sst [smem:[#allocation16_spill]] %s2204_s0 }
   0x2   :  { %2216 = sst [smem:[#allocation17_spill]] %s2205_s1 }
   0x3   :  { %2217 = sst [smem:[#allocation18_spill]] %s2206_s2 }
   0x4   :  { %9 = vsyncpa [#allocation4], 0 }
   0x5   :  { %11 = vsyncpa [#allocation4 + $0x1], 0 }
   0x6   :  { %12 = vsyncpa [#allocation7], 0 }
   0x7   :  { %13 = vsyncpa [#allocation10], 0 }
   0x8   :  { %15 = vsyncpa [#allocation10 + $0x1], 0 }
   0x9   :  { %16 = vsyncpa [#allocation5], 0 }
   0xa   :  { %18 = vsyncpa [#allocation5 + $0x1], 0  ;;  %s1802_s15 = smov 0   ;;  %s1804_s16 = smov 0  }
   0xb   :  { %s1806_s17 = smov 0   ;;  %s1808_s18 = smov 0  }
   0xc   :  { %s1810_s19 = smov 0   ;;  %s1812_s20 = smov 0  }
   0xd LB: > { %s1262_s21 = sadd.s32 4294967295, %s1764_s20   ;;  %s1263_s22 = sadd.s32 4294967294, %s1764_s20   ;;  %s1764_s20 = sphi %s1812_s20, %s24_s20   ;;  %s1760_s19 = sphi %s1810_s19, %s2241_s19   ;;  %s1756_s18 = sphi %s1808_s18, %s2240_s18   ;;  %s1752_s17 = sphi %s1806_s17, %s2239_s17   ;;  %s1748_s16 = sphi %s1804_s16, %s2238_s16   ;;  %s1744_s15 = sphi %s1802_s15, %s2237_s15  }
   0xe   : > { %p59_p0 = scmp.ne.s32.totalorder %s1752_s17, %s1748_s16  ;;  %p60_p1 = scmp.eq.s32.totalorder %s1764_s20, 0 }
   0xf   : > { %p65_p2 = scmp.ne.s32.totalorder %s1748_s16, %s1744_s15  ;;  %p1840_p3 = scmp.eq.s32.totalorder %s1262_s21, 0 }
  0x10   : > { %p175_p4 = scmp.eq.s32.totalorder %s1262_s21, 11  ;;  %p1844_p5 = por %p60_p1, %p59_p0 }
  0x11   : > { %s2218_s24 = scalar_select %p1840_p3, 1, 0 }
  0x12   : > { %p181_p6 = scmp.eq.s32.totalorder %s1263_s22, 11  ;;  %p1850_p7 = por %p1840_p3, %p65_p2 }
  0x13   : > { %p1854_p8 = por %p175_p4, %p59_p0  ;;  %p1264_p10 = scmp.ge.s32.totalorder %s1764_s20, 1 }
  0x14   : > { %s2220_s26 = scalar_select %p1850_p7, 1, 0 }
  0x15   : > { %s2221_s27 = scalar_select %p1854_p8, 1, 0 }
  0x16   : > { %p1858_p9 = por %p181_p6, %p65_p2  ;;  %p188_p11 = scmp.lt.s32.totalorder %s1764_s20, 13 }
  0x17   : > { %s1766_s30 = smov [#allocation6]   ;;  %s1767_s7 = smov [#allocation8]  }
  0x18   : > { %s2222_s28 = scalar_select %p1858_p9, 1, 0 }
  0x19   : > { %p1864_p12 = pnand %p1264_p10, %p188_p11  ;;  %s202_s5 = sshll.u32 %s1766_s30, 4  ;;  %s1868_s5 = int_to_ptr.vmem [resolvable:$true] %s202_s5 }
  0x1a   : > { %s218_s8 = sshll.u32 %s1767_s7, 4  ;;  %s2225_s1 = sld [smem:[#allocation17_spill]]  ;;  %s1878_s8 = int_to_ptr.vmem [resolvable:$true] %s218_s8 }
  0x1b   : > { %p1446_p13 = pneg %p1864_p12 }
  0x1d   : > { %p1874_p0 = pnand %p1446_p13, %p1840_p3 }
  0x1f   : > { %p1560_p2 = pneg %p1874_p0 }
  0x20   : > { %s1558_s12 = scalar_lea.hbm %s2225_s1, 2304 }
  0x21   : > { %p1559_p1 = scmp.ne.s32.totalorder %s2225_s1, %s1558_s12  ;;  %p1565_p10 = scmp.lt.u32.totalorder %s1558_s12, %s2225_s1 }
  0x23   : > { %p1561_p4 = pnand %p1560_p2, %p1559_p1 }
  0x25   : > { %p1562_p6 = pneg %p1561_p4 }
  0x27   : > { %p1567_p11 = pnand %p1565_p10, %p1562_p6 }
  0x29   : > { %1570 = shalt.err (!%p1567_p11)
}
  0x2a   : > { %s1571_s30 = scalar_lea.vmem %s1868_s5, 2304  ;;  %p1579_p3 = scmp.lt.s32.totalorder %s1868_s5, %s1868_s5 }
  0x2b   : > { %p1572_p13 = scmp.ne.s32.totalorder %s1868_s5, %s1571_s30  ;;  %p1580_p1 = scmp.lt.s32.totalorder %s1571_s30, %s1571_s30 }
  0x2d   : > { %p1574_p9 = pnand %p1572_p13, %p1560_p2  ;;  %p1581_p4 = por %p1580_p1, %p1579_p3 }
  0x2f   : > { %p1575_p8 = pneg %p1574_p9 }
  0x31   : > { %p1582_p7 = pnand %p1581_p4, %p1575_p8 }
  0x33   : > { %1585 = shalt.err (!%p1582_p7)
}
  0x34   : > { %s2213_s7 = smov 64   ;;  %s1769_s10 = smov 4  }
  0x35   : > { %1449 = dma.hbm_to_vmem [thread:$0]  (!%p1874_p0), %s2225_s1, 2304, %s1868_s5, [#allocation7], %s2213_s7, %s2213_s7, %s1769_s10  }
  0x36   : > { %s2226_s2 = sld [smem:[#allocation18_spill]] }
  0x3c   : > { %s1586_s21 = scalar_lea.hbm %s2226_s2, 16 }
  0x3d   : > { %p1587_p3 = scmp.ne.s32.totalorder %s2226_s2, %s1586_s21  ;;  %p1593_p9 = scmp.lt.u32.totalorder %s1586_s21, %s2226_s2 }
  0x3f   : > { %p1589_p7 = pnand %p1587_p3, %p1560_p2 }
  0x41   : > { %p1590_p8 = pneg %p1589_p7 }
  0x43   : > { %p1595_p6 = pnand %p1593_p9, %p1590_p8 }
  0x45   : > { %1598 = shalt.err (!%p1595_p6)
}
  0x46   : > { %s1599_s5 = scalar_lea.vmem %s1878_s8, 16  ;;  %s1606_s11 = scalar_lea.vmem %s1878_s8, 32 }
  0x47   : > { %p1600_p10 = scmp.ne.s32.totalorder %s1878_s8, %s1599_s5  ;;  %p1607_p1 = scmp.lt.s32.totalorder %s1878_s8, %s1878_s8 }
  0x48   : > { %p1608_p4 = scmp.lt.s32.totalorder %s1606_s11, %s1599_s5 }
  0x49   : > { %p1602_p11 = pnand %p1600_p10, %p1560_p2 }
  0x4a   : > { %p1609_p3 = por %p1608_p4, %p1607_p1 }
  0x4b   : > { %p1603_p13 = pneg %p1602_p11 }
  0x4d   : > { %p1610_p7 = pnand %p1609_p3, %p1603_p13 }
  0x4f   : > { %1613 = shalt.err (!%p1610_p7)
}
  0x50   : > { %1452 = dma.hbm_to_vmem [thread:$0]  (!%p1874_p0), %s2226_s2, 16, %s1878_s8, [#allocation7]  }
  0x51   : > { %s2227_s12 = sadd.s32 1, %s1760_s19  ;;  %p1466_p8 = scmp.lt.s32.totalorder %s1764_s20, 12 }
  0x52   : > { %p41_p2 = scmp.ge.s32.totalorder %s2227_s12, 12  ;;  %s1941_s13 = sand.u32 1, %s1752_s17  }
  0x53   : > { %s1430_s6 = smul.u32 448, %s1760_s19  ;;  %s2228_s14 = smov %s2227_s12 }
  0x54   : > { %s2243_s14 = smov (%p41_p2, %s2228_s14), 0  ;;  %s1429_s21 = smul.u32 28, %s1941_s13 }
  0x55   : > { %s48_s22 = ssub.s32 %s1760_s19, %s2243_s14  ;;  %s2229_s0 = sld [smem:[#allocation16_spill]] }
  0x56   : > { %p50_p0 = scmp.eq.s32.totalorder %s48_s22, 0  ;;  %s233_s8 = scalar_lea.vmem [#allocation3], %s1429_s21 }
  0x57   : > { %s242_s23 = sshll.u32 %s233_s8, 4  ;;  %p1958_p9 = pnand %p1466_p8, %p1844_p5  ;;  %s1967_s23 = int_to_ptr.vmem [resolvable:$true] %s242_s23 }
  0x58   : > { %s2231_s12 = sadd.s32 1, %s1752_s17 }
  0x59   : > { %s1965_s7 = scalar_select %p50_p0, %s1752_s17, %s2231_s12  }
  0x5a   : > { %p1616_p10 = pneg %p1958_p9 }
  0x5b   : > { %s1954_s11 = scalar_lea.hbm %s2229_s0, %s1430_s6  ;;  %s230_s6 = scalar_lea.sflag [#allocation4], %s1941_s13 }
  0x5c   : > { %s1614_s30 = scalar_lea.hbm %s1954_s11, 448  ;;  %s1619_s22 = scalar_lea.hbm %s2229_s0, 5376 }
  0x5d   : > { %p1615_p6 = scmp.ne.s32.totalorder %s1954_s11, %s1614_s30  ;;  %p1620_p5 = scmp.lt.u32.totalorder %s1954_s11, %s2229_s0 }
  0x5e   : > { %p1621_p1 = scmp.lt.u32.totalorder %s1619_s22, %s1614_s30  ;;  %p1623_p3 = scmp.lt.u32.totalorder %s1614_s30, %s1954_s11 }
  0x5f   : > { %p1617_p11 = pnand %p1616_p10, %p1615_p6 }
  0x60   : > { %p1622_p4 = por %p1621_p1, %p1620_p5 }
  0x61   : > { %p1618_p13 = pneg %p1617_p11 }
  0x62   : > { %p1624_p7 = por %p1623_p3, %p1622_p4 }
  0x64   : > { %p1625_p2 = pnand %p1624_p7, %p1618_p13 }
  0x66   : > { %1628 = shalt.err (!%p1625_p2)
}
  0x67   : > { %s1629_s12 = scalar_lea.vmem %s1967_s23, 448  ;;  %s1770_s25 = smov [#allocation3]  }
  0x68   : > { %p1630_p8 = scmp.ne.s32.totalorder %s1967_s23, %s1629_s12  ;;  %s1634_s21 = sshll.u32 %s1770_s25, 4  ;;  %s1635_s21 = int_to_ptr.vmem [resolvable:$false] %s1634_s21 }
  0x69   : > { %s1636_s5 = scalar_lea.vmem %s1635_s21, 896  ;;  %p1637_p11 = scmp.lt.s32.totalorder %s1967_s23, %s1635_s21 }
  0x6a   : > { %p1632_p0 = pnand %p1630_p8, %p1616_p10  ;;  %p1638_p5 = scmp.lt.s32.totalorder %s1636_s5, %s1629_s12 }
  0x6c   : > { %p1633_p6 = pneg %p1632_p0  ;;  %p1639_p1 = por %p1638_p5, %p1637_p11 }
  0x6e   : > { %p1640_p4 = pnand %p1639_p1, %p1633_p6 }
  0x70   : > { %1643 = shalt.err (!%p1640_p4)
}
  0x71   : > { %s2232_s30 = smov 64   ;;  %s1269_s22 = sshll.u32 %s1941_s13, 3 }
  0x72   : > { %1456 = dma.hbm_to_vmem [thread:$0]  (!%p1958_p9), %s1954_s11, 448, %s1967_s23, %s230_s6, %s2232_s30, %s2232_s30, %s1769_s10  }
  0x73   : > { %s1326_s8 = sshll.u32 %s1760_s19, 7  ;;  %s256_s5 = scalar_lea.vmem [#allocation9], %s1269_s22 }
  0x74   : > { %s2005_s21 = scalar_lea.hbm %s2207_s3, %s1326_s8  ;;  %s266_s0 = sshll.u32 %s256_s5, 4  ;;  %s2007_s0 = int_to_ptr.vmem [resolvable:$true] %s266_s0 }
  0x75   : > { %s253_s1 = scalar_lea.sflag [#allocation10], %s1941_s13  ;;  %s1644_s2 = scalar_lea.hbm %s2005_s21, 128 }
  0x76   : > { %p1645_p13 = scmp.ne.s32.totalorder %s2005_s21, %s1644_s2  ;;  %s1649_s6 = scalar_lea.hbm %s2207_s3, 1536 }
  0x77   : > { %p1650_p2 = scmp.lt.u32.totalorder %s2005_s21, %s2207_s3  ;;  %p1651_p8 = scmp.lt.u32.totalorder %s1649_s6, %s1644_s2 }
  0x78   : > { %p1647_p3 = pnand %p1645_p13, %p1616_p10  ;;  %p1653_p6 = scmp.lt.u32.totalorder %s1644_s2, %s2005_s21 }
  0x79   : > { %p1652_p0 = por %p1651_p8, %p1650_p2 }
  0x7a   : > { %p1648_p7 = pneg %p1647_p3 }
  0x7b   : > { %p1654_p11 = por %p1653_p6, %p1652_p0 }
  0x7d   : > { %p1655_p5 = pnand %p1654_p11, %p1648_p7 }
  0x7f   : > { %1658 = shalt.err (!%p1655_p5)
}
  0x80   : > { %s1659_s22 = scalar_lea.vmem %s2007_s0, 128  ;;  %s1771_s25 = smov [#allocation9]  }
  0x81   : > { %p1660_p1 = scmp.ne.s32.totalorder %s2007_s0, %s1659_s22  ;;  %s1664_s5 = sshll.u32 %s1771_s25, 4  ;;  %s1665_s5 = int_to_ptr.vmem [resolvable:$false] %s1664_s5 }
  0x82   : > { %s1666_s11 = scalar_lea.vmem %s1665_s5, 256  ;;  %p1667_p3 = scmp.lt.s32.totalorder %s2007_s0, %s1665_s5 }
  0x83   : > { %p1662_p4 = pnand %p1660_p1, %p1616_p10  ;;  %p1668_p2 = scmp.lt.s32.totalorder %s1666_s11, %s1659_s22 }
  0x85   : > { %p1663_p13 = pneg %p1662_p4  ;;  %p1669_p8 = por %p1668_p2, %p1667_p3 }
  0x87   : > { %p1670_p0 = pnand %p1669_p8, %p1663_p13 }
  0x89   : > { %1673 = shalt.err (!%p1670_p0)
}
  0x8a   : > { %1459 = dma.hbm_to_vmem [thread:$0]  (!%p1958_p9), %s2005_s21, 128, %s2007_s0, %s253_s1, %s2232_s30, %s2232_s30, %s1769_s10  }
  0x8b   : > { %278 = sbr.rel (%p1864_p12) target bundleno = 490 (0x1ea), region = 36  ;;  %s2041_s2 = sand.u32 (!%p1864_p12), 1, %s1748_s16  }
  0x8c   : > { %s1431_s23 = smul.u32 (!%p1864_p12), 28, %s2041_s2  ;;  %s281_s6 = scalar_lea.sflag (!%p1864_p12), [#allocation4], %s2041_s2 }
  0x8d   : > { %p2233_p10 = scmp.ne.s32.totalorder (!%p1864_p12), %s2220_s26, 0 }
  0x8e   : > { %s2045_s9 = scalar_lea.vmem (!%p1864_p12), [#allocation3], %s1431_s23 }
  0x92   : > { %1727 = dma.done.wait (%p2233_p10), %s281_s6, 448  }
  0x93   : > { %1729 = vsyncadd (%p2233_p10), %s281_s6, 4294966848  ;;  %p2234_p9 = scmp.ne.s32.totalorder %s2218_s24, 0 }
  0x95   : > { %1731 = dma.done.wait (%p2234_p9), [#allocation7], 2320  }
  0x96   : > { %1733 = vsyncadd (%p2234_p9), [#allocation7], 4294964976  ;;  %s1275_s0 = sshll.u32 %s2041_s2, 3  ;;  %s298_s1 = scalar_lea.sflag [#allocation10], %s2041_s2 }
  0x97   : > { %s2059_s29 = scalar_lea.vmem [#allocation9], %s1275_s0 }
  0x98   : > { %1735 = dma.done.wait (%p2233_p10), %s298_s1, 128  }
  0x99   : > { %1737 = vsyncadd (%p2233_p10), %s298_s1, 4294967168  ;;  %v1772_v0 = vmov 0.0   ;;  %vm1773_vm0 = vmmov 0   ;;  %v1526_v1 = vld [vmem:[#allocation6] sm:$0xff]   ;;  %v1527_v2 = vld [vmem:[#allocation6 + $0x8] sm:$0xff]   ;;  %vm355_vm1 = vcmask 261120  }
  0x9a   : > { %1357 = vmatprep.subr.bf16.mxu0 %v1772_v0  ;;  %1365 = vmatprep.subr.bf16.mxu1 %v1772_v0  ;;  %v1528_v3 = vld [vmem:[#allocation6 + $0x10] sm:$0xff]   ;;  %v1529_v4 = vld [vmem:[%s2045_s9] sm:$0x7f]   ;;  %v1530_v5 = vld [vmem:[#allocation6 + $0x18] sm:$0xff]   ;;  %vm578_vm2 = vcmask 1044480   ;;  %vm830_vm4 = vcmask 1045504  }
  0x9b   : > { %1361 = vmatprep.mubr.msk.bf16.mxu0 %vm1773_vm0, %v1772_v0  ;;  %1369 = vmatprep.mubr.msk.bf16.mxu1 %vm1773_vm0, %v1772_v0  ;;  %v1531_v6 = vld [vmem:[%s2045_s9] sm:$0xff]   ;;  %v1535_v13 = vld [vmem:[#allocation6 + $0x30] sm:$0xff]   ;;  %v1536_v17 = vld [vmem:[#allocation6 + $0x38] sm:$0xff]   ;;  %vm660_vm3 = vsmask.f32 4352  ;;  %vm400_vm6 = vcmask 523264  }
  0x9c   : > { %1358 = vmatpush3.bf16.msra.mxu0 %v1526_v1  ;;  %1366 = vmatpush3.bf16.msra.mxu1 %v1528_v3  ;;  %v1532_v7 = vld [vmem:[#allocation6 + $0x20] sm:$0xff]   ;;  %v419_v8 = vshrl.u32 %v1531_v6, 16  ;;  %v421_v9 = vshll.u32 %v1531_v6, 16  ;;  %v1533_v10 = vld [vmem:[#allocation6 + $0x28] sm:$0xff]   ;;  %v1543_v25 = vld [vmem:[#allocation6 + $0x50] sm:$0xff]   ;;  %vm402_vm7 = vcmask 521216  }
  0x9d   : > { %1359 = vmatprep.subr.bf16.mxu0 %v1772_v0  ;;  %1367 = vmatprep.subr.bf16.mxu1 %v1772_v0  ;;  %v1534_v12 = vld [vmem:[%s2045_s9] sm:$0xfe]   ;;  %v1538_v18 = vld [vmem:[%s2045_s9 + $0xc] ss:$0 sps:$4 sm:$0x33]   ;;  %v1544_v35 = vld [vmem:[#allocation6 + $0x58] sm:$0xff]  }
  0x9e   : > { %v423_v11 = vrot.slane %v421_v9, 1  ;;  %v499_v15 = vrot.slane %v1534_v12, 1  ;;  %v1537_v16 = vld [vmem:[%s2045_s9 + $0x4] sm:$0xf8]   ;;  %v1539_v20 = vld [vmem:[#allocation6 + $0x40] sm:$0xff]   ;;  %v580_v21 = vrot.slane %v1538_v18, 3 }
  0x9f   : > { %v579_v19 = vrot.slane %v1537_v16, 3  ;;  %v1540_v22 = vld [vmem:[#allocation6 + $0x48] sm:$0xff]   ;;  %v1542_v24 = vld [vmem:[%s2045_s9 + $0xc] ss:$0 sps:$4 sm:$0x77]   ;;  %v1546_v36 = vld [vmem:[#allocation6 + $0x60] sm:$0xff]  }
  0xa0   : > { %1360 = vmatpush3.bf16.msra.mxu0 %v1527_v2  ;;  %1368 = vmatpush3.bf16.msra.mxu1 %v1530_v5  ;;  %v424_v14 = vor.u32 %v423_v11, %v419_v8  ;;  %v1541_v23 = vld [vmem:[%s2045_s9 + $0x4] sm:$0xf8]   ;;  %v670_v29 = vshrl.u32 %v1542_v24, 16  ;;  %v673_v30 = vshll.u32 %v1542_v24, 16  ;;  %v1548_v40 = vld [vmem:[%s2045_s9 + $0xc] sm:$0xfc]  }
  0xa1   : > { %1373 = vmatprep.subr.bf16.mxu0 %v1772_v0  ;;  %1381 = vmatprep.subr.bf16.mxu1 %v1772_v0  ;;  %v581_v26 = vsel %vm578_vm2, %v579_v19, %v580_v21  ;;  %v662_v27 = vshrl.u32 %v1541_v23, 16  ;;  %v665_v28 = vshll.u32 %v1541_v23, 16  ;;  %v1545_v39 = vld [vmem:[%s2045_s9 + $0x8] sm:$0x7f]   ;;  %v831_v45 = vrot.slane %v1548_v40, 2  ;;  %v1551_v48 = vld [vmem:[#allocation6 + $0x78] sm:$0xff]  }
  0xa2   : > { %v672_v33 = vrot.slane %v670_v29, 3  ;;  %v675_v34 = vrot.slane %v673_v30, 4  ;;  %v1549_v41 = vld [vmem:[%s2045_s9 + $0x14] ss:$0 sps:$4 sm:$0x11]   ;;  %v1547_v43 = vld [vmem:[#allocation6 + $0x68] sm:$0xff]  }
  0xa3   : > { %1362 = vmatmul.mubr.msk.bf16.vlgmr.msra.gmra.mrb[0].mxu0 %vm355_vm1, %v1529_v4  ;;  %1370 = vmatmul.mubr.msk.bf16.vlgmr.msra.gmra.mrb[0].mxu1 %vm355_vm1, %v424_v14  ;;  %v664_v31 = vrot.slane %v662_v27, 3  ;;  %v667_v32 = vrot.slane %v665_v28, 4  ;;  %v1550_v44 = vld [vmem:[#allocation6 + $0x70] sm:$0xff]   ;;  %v832_v46 = vrot.slane %v1549_v41, 2  ;;  %v1554_v52 = vld [vmem:[#allocation6 + $0x80] sm:$0xff]   ;;  %v1555_v1 = vld [vmem:[#allocation6 + $0x88] sm:$0xff]  }
  0xa4   : > { %1374 = vmatpush3.bf16.msra.mxu0 %v1532_v7  ;;  %1377 = vmatprep.mubr.msk.bf16.mxu0 %vm1773_vm0, %v1772_v0  ;;  %v676_v38 = vor.u32 %v675_v34, %v672_v33  ;;  %v1552_v47 = vld [vmem:[%s2045_s9 + $0xc] sm:$0xfc]   ;;  %v1553_v49 = vld [vmem:[%s2045_s9 + $0x14] ss:$0 sps:$4 sm:$0x33]   ;;  %s1329_s24 = sshll.u32 %s1756_s18, 7 }
  0xa5   : > { %1375 = vmatprep.subr.bf16.mxu0 %v1772_v0  ;;  %1382 = vmatpush3.bf16.msra.mxu1 %v1535_v13  ;;  %v668_v37 = vor.u32 %v667_v32, %v664_v31  ;;  %v914_v50 = vshrl.u32 %v1552_v47, 16  ;;  %v917_v51 = vshll.u32 %v1552_v47, 16  ;;  %v922_v53 = vshrl.u32 %v1553_v49, 16  ;;  %v1556_v60 = vld [vmem:[%s2045_s9 + $0xc] sm:$0xf8]   ;;  %s330_s26 = scalar_lea.vmem [#allocation11], %s1275_s0  ;;  %s2154_s21 = scalar_lea.hbm %s2208_s4, %s1329_s24 }
  0xa6   : > { %1383 = vmatprep.subr.bf16.mxu1 %v1772_v0  ;;  %1385 = vmatprep.mubr.msk.bf16.mxu1 %vm1773_vm0, %v1772_v0  ;;  %v925_v54 = vshll.u32 %v1553_v49, 16  ;;  %v833_v55 = vsel %vm830_vm4, %v831_v45, %v832_v46  ;;  %vm912_vm5 = vsmask.f32 5376  ;;  %v1557_v62 = vld [vmem:[%s2045_s9 + $0x14] ss:$0 sps:$4 sm:$0x33]  }
  0xa7   : > { %v677_v42 = vsel %vm660_vm3, %v668_v37, %v676_v38  ;;  %v916_v56 = vrot.slane %v914_v50, 2  ;;  %v919_v57 = vrot.slane %v917_v51, 3  ;;  %v924_v58 = vrot.slane %v922_v53, 2  ;;  %s1121_s10 = sshll.u32 %s330_s26, 4  ;;  %s1105_s18 = scalar_lea.sflag [#allocation5], %s2041_s2  ;;  %s2156_s10 = int_to_ptr.vmem [resolvable:$true] %s1121_s10 }
  0xa8   : > { %1376 = vmatpush3.bf16.msra.mxu0 %v1533_v10  ;;  %v927_v59 = vrot.slane %v925_v54, 3  ;;  %v1008_v2 = vrot.slane %v1556_v60, 3  ;;  %v1009_v3 = vrot.slane %v1557_v62, 3  ;;  %vm1100_vm8 = vcmask 519168   ;;  %s1674_s8 = scalar_lea.vmem %s2156_s10, 128  ;;  %p2235_p7 = scmp.ne.s32.totalorder %s2221_s27, 0 }
  0xa9   : > { %1389 = vmatprep.subr.bf16.mxu0 %v1772_v0  ;;  %1384 = vmatpush3.bf16.msra.mxu1 %v1536_v17  ;;  %v920_v61 = vor.u32 %v919_v57, %v916_v56  ;;  %vm1102_vm9 = vcmask 517120   ;;  %p1675_p12 = scmp.ne.s32.totalorder %s2156_s10, %s1674_s8  ;;  %s1774_s12 = smov [#allocation11]  }
  0xaa   : > { %1397 = vmatprep.subr.bf16.mxu1 %v1772_v0  ;;  %v928_v63 = vor.u32 %v927_v59, %v924_v58  ;;  %v1010_v5 = vsel %vm578_vm2, %v1008_v2, %v1009_v3  ;;  %s1678_s22 = sshll.u32 %s1774_s12, 4  ;;  %s1679_s22 = int_to_ptr.vmem [resolvable:$false] %s1678_s22 }
  0xab   : > { %1378 = vmatmul.mubr.msk.bf16.vlgmr.msra.gmra.mrb[4].mxu0 %vm355_vm1, %v499_v15  ;;  %p1676_p6 = pnand %p1675_p12, %p2235_p7  ;;  %s1680_s25 = scalar_lea.vmem %s1679_s22, 256 }
  0xac   : > { %1390 = vmatpush3.bf16.msra.mxu0 %v1539_v20  ;;  %1393 = vmatprep.mubr.msk.bf16.mxu0 %vm1773_vm0, %v1772_v0  ;;  %v929_v4 = vsel %vm912_vm5, %v920_v61, %v928_v63  ;;  %p1681_p5 = scmp.lt.s32.totalorder %s2156_s10, %s1679_s22  ;;  %p1682_p1 = scmp.lt.s32.totalorder %s1680_s25, %s1674_s8 }
  0xad   : > { %1391 = vmatprep.subr.bf16.mxu0 %v1772_v0  ;;  %1386 = vmatmul.mubr.msk.bf16.vlgmr.msra.gmra.mrb[4].mxu1 %vm355_vm1, %v581_v26  ;;  %p1677_p11 = pneg %p1676_p6 }
  0xae   : > { %1398 = vmatpush3.bf16.msra.mxu1 %v1543_v25  ;;  %1401 = vmatprep.mubr.msk.bf16.mxu1 %vm1773_vm0, %v1772_v0  ;;  %p1683_p4 = por %p1682_p1, %p1681_p5 }
  0xaf   : > { %1399 = vmatprep.subr.bf16.mxu1 %v1772_v0 }
  0xb0   : > { %1392 = vmatpush3.bf16.msra.mxu0 %v1540_v22  ;;  %p1684_p13 = pnand %p1683_p4, %p1677_p11 }
  0xb1   : > { %1405 = vmatprep.subr.bf16.mxu0 %v1772_v0 }
  0xb2   : > { %1400 = vmatpush3.bf16.msra.mxu1 %v1544_v35 }
  0xb3   : > { %1394 = vmatmul.mubr.msk.bf16.vlgmr.msra.gmra.mrb[8].mxu0 %vm355_vm1, %v677_v42  ;;  %1413 = vmatprep.subr.bf16.mxu1 %v1772_v0 }
  0xb4   : > { %1406 = vmatpush3.bf16.msra.mxu0 %v1546_v36  ;;  %1409 = vmatprep.mubr.msk.bf16.mxu0 %vm1773_vm0, %v1772_v0 }
  0xb5   : > { %1407 = vmatprep.subr.bf16.mxu0 %v1772_v0  ;;  %1402 = vmatmul.mubr.msk.bf16.vlgmr.msra.gmra.mrb[8].mxu1 %vm355_vm1, %v1545_v39 }
  0xb6   : > { %1414 = vmatpush3.bf16.msra.mxu1 %v1550_v44  ;;  %1417 = vmatprep.mubr.msk.bf16.mxu1 %vm1773_vm0, %v1772_v0 }
  0xb7   : > { %1415 = vmatprep.subr.bf16.mxu1 %v1772_v0 }
  0xb8   : > { %1408 = vmatpush3.bf16.msra.mxu0 %v1547_v43 }
  0xb9   : > { %1421 = vmatprep.subr.bf16.mxu0 %v1772_v0 }
  0xba   : > { %1416 = vmatpush3.bf16.msra.mxu1 %v1551_v48 }
  0xbb   : > { %1410 = vmatmul.mubr.msk.bf16.vlgmr.msra.gmra.mrb[12].mxu0 %vm355_vm1, %v833_v55 }
  0xbc   : > { %1422 = vmatpush3.bf16.msra.mxu0 %v1554_v52  ;;  %1425 = vmatprep.mubr.msk.bf16.mxu0 %vm1773_vm0, %v1772_v0 }
  0xbd   : > { %1423 = vmatprep.subr.bf16.mxu0 %v1772_v0  ;;  %1418 = vmatmul.mubr.msk.bf16.vlgmr.msra.gmra.mrb[12].mxu1 %vm355_vm1, %v929_v4 }
  0xc0   : > { %1424 = vmatpush3.bf16.msra.mxu0 %v1555_v1 }
  0xc3   : > { %1426 = vmatmul.mubr.msk.bf16.vlgmr.msra.gmra.mrb[16].mxu0 %vm355_vm1, %v1010_v5 }
 0x176   : > { %v393_v6 = vpop.f32.mrb[0].mxu0  ;;  %v474_v10 = vpop.f32.mrb[0].mxu1 }
 0x177   : > { %401 = vst.msk [vmem:[#allocation2] sm:$0xff] %vm400_vm6, %v393_v6  ;;  %v1363_v7 = vpop.f32.mrb[1].mxu0  ;;  %v1371_v11 = vpop.f32.mrb[1].mxu1 }
 0x178   : > { %v396_v8 = vpop.f32.mrb[2].mxu0  ;;  %v477_v0 = vpop.f32.mrb[2].mxu1 }
 0x179   : > { %403 = vst.msk [vmem:[#allocation2 + $0x8] sm:$0x3f] %vm402_vm7, %v396_v8  ;;  %v1364_v9 = vpop.f32.mrb[3].mxu0  ;;  %v1372_v12 = vpop.f32.mrb[3].mxu1 }
 0x17e   : > { %v404_v13 = vld [vmem:[#allocation2] sm:$0xff]  ;;  %v549_v14 = vpop.f32.mrb[4].mxu0 }
 0x17f   : > { %v481_v15 = vadd.f32 %v474_v10, %v404_v13  ;;  %v1379_v16 = vpop.f32.mrb[5].mxu0  ;;  %v1318_v10 = vld [vmem:[#allocation8] ss:$0 sm:$0xff] }
 0x180   : > { %v405_v17 = vld [vmem:[#allocation2 + $0x8] sm:$0x3f]  ;;  %v552_v18 = vpop.f32.mrb[6].mxu0  ;;  %v631_v21 = vpop.f32.mrb[4].mxu1 }
 0x181   : > { %483 = vst.msk [vmem:[#allocation2] sm:$0xff] %vm400_vm6, %v481_v15  ;;  %v482_v19 = vadd.f32 %v477_v0, %v405_v17  ;;  %v1380_v20 = vpop.f32.mrb[7].mxu0  ;;  %v1387_v22 = vpop.f32.mrb[5].mxu1  ;;  %v1086_v0 = vld [vmem:[%s2059_s29] sm:$0xf] }
 0x182   : > { %v634_v23 = vpop.f32.mrb[6].mxu1  ;;  %v1088_v17 = vunpack.c.l.bf16 %v1086_v0 }
 0x183   : > { %484 = vst.msk [vmem:[#allocation2 + $0x8] sm:$0x3f] %vm402_vm7, %v482_v19  ;;  %v1388_v24 = vpop.f32.mrb[7].mxu1 }
 0x186   : > { %v727_v25 = vpop.f32.mrb[8].mxu0 }
 0x187   : > { %v1395_v27 = vpop.f32.mrb[9].mxu0 }
 0x188   : > { %v485_v26 = vld [vmem:[#allocation2] sm:$0xff]  ;;  %v730_v29 = vpop.f32.mrb[10].mxu0  ;;  %v801_v32 = vpop.f32.mrb[8].mxu1 }
 0x189   : > { %v556_v28 = vadd.f32 %v549_v14, %v485_v26  ;;  %v1396_v31 = vpop.f32.mrb[11].mxu0  ;;  %v1403_v34 = vpop.f32.mrb[9].mxu1  ;;  %v1087_v14 = vld [vmem:[%s2059_s29 + $0x4] sm:$0x3] }
 0x18a   : > { %v486_v30 = vld [vmem:[#allocation2 + $0x8] sm:$0x3f]  ;;  %v804_v35 = vpop.f32.mrb[10].mxu1  ;;  %v1089_v20 = vunpack.c.l.bf16 %v1087_v14 }
 0x18b   : > { %558 = vst.msk [vmem:[#allocation2] sm:$0xff] %vm400_vm6, %v556_v28  ;;  %v557_v33 = vadd.f32 %v552_v18, %v486_v30  ;;  %v1404_v36 = vpop.f32.mrb[11].mxu1 }
 0x18d   : > { %559 = vst.msk [vmem:[#allocation2 + $0x8] sm:$0x3f] %vm402_vm7, %v557_v33 }
 0x18e   : > { %v883_v37 = vpop.f32.mrb[12].mxu0 }
 0x18f   : > { %v1411_v38 = vpop.f32.mrb[13].mxu0 }
 0x190   : > { %v886_v39 = vpop.f32.mrb[14].mxu0  ;;  %v979_v42 = vpop.f32.mrb[12].mxu1 }
 0x191   : > { %v1412_v41 = vpop.f32.mrb[15].mxu0  ;;  %v1419_v44 = vpop.f32.mrb[13].mxu1 }
 0x192   : > { %v560_v40 = vld [vmem:[#allocation2] sm:$0xff]  ;;  %v982_v46 = vpop.f32.mrb[14].mxu1 }
 0x193   : > { %v638_v43 = vadd.f32 %v631_v21, %v560_v40  ;;  %v1420_v48 = vpop.f32.mrb[15].mxu1 }
 0x194   : > { %v561_v45 = vld [vmem:[#allocation2 + $0x8] sm:$0x3f] }
 0x195   : > { %640 = vst.msk [vmem:[#allocation2] sm:$0xff] %vm400_vm6, %v638_v43  ;;  %v639_v47 = vadd.f32 %v634_v23, %v561_v45 }
 0x196   : > { %v1060_v49 = vpop.f32.mrb[16].mxu0 }
 0x197   : > { %641 = vst.msk [vmem:[#allocation2 + $0x8] sm:$0x3f] %vm402_vm7, %v639_v47  ;;  %v1427_v50 = vpop.f32.mrb[17].mxu0 }
 0x198   : > { %v1063_v51 = vpop.f32.mrb[18].mxu0 }
 0x199   : > { %v1428_v52 = vpop.f32.mrb[19].mxu0 }
 0x19c   : > { %v642_v53 = vld [vmem:[#allocation2] sm:$0xff] }
 0x19d   : > { %v734_v54 = vadd.f32 %v727_v25, %v642_v53 }
 0x19e   : > { %v643_v55 = vld [vmem:[#allocation2 + $0x8] sm:$0x3f] }
 0x19f   : > { %736 = vst.msk [vmem:[#allocation2] sm:$0xff] %vm400_vm6, %v734_v54  ;;  %v735_v56 = vadd.f32 %v730_v29, %v643_v55 }
 0x1a1   : > { %737 = vst.msk [vmem:[#allocation2 + $0x8] sm:$0x3f] %vm402_vm7, %v735_v56 }
 0x1a6   : > { %v738_v57 = vld [vmem:[#allocation2] sm:$0xff] }
 0x1a7   : > { %v808_v58 = vadd.f32 %v801_v32, %v738_v57 }
 0x1a8   : > { %v739_v59 = vld [vmem:[#allocation2 + $0x8] sm:$0x3f] }
 0x1a9   : > { %810 = vst.msk [vmem:[#allocation2] sm:$0xff] %vm400_vm6, %v808_v58  ;;  %v809_v60 = vadd.f32 %v804_v35, %v739_v59 }
 0x1ab   : > { %811 = vst.msk [vmem:[#allocation2 + $0x8] sm:$0x3f] %vm402_vm7, %v809_v60 }
 0x1b0   : > { %v812_v61 = vld [vmem:[#allocation2] sm:$0xff] }
 0x1b1   : > { %v890_v62 = vadd.f32 %v883_v37, %v812_v61 }
 0x1b2   : > { %v813_v63 = vld [vmem:[#allocation2 + $0x8] sm:$0x3f] }
 0x1b3   : > { %892 = vst.msk [vmem:[#allocation2] sm:$0xff] %vm400_vm6, %v890_v62  ;;  %v891_v1 = vadd.f32 %v886_v39, %v813_v63 }
 0x1b5   : > { %893 = vst.msk [vmem:[#allocation2 + $0x8] sm:$0x3f] %vm402_vm7, %v891_v1 }
 0x1ba   : > { %v894_v2 = vld [vmem:[#allocation2] sm:$0xff] }
 0x1bb   : > { %v986_v3 = vadd.f32 %v979_v42, %v894_v2 }
 0x1bc   : > { %v895_v4 = vld [vmem:[#allocation2 + $0x8] sm:$0x3f] }
 0x1bd   : > { %988 = vst.msk [vmem:[#allocation2] sm:$0xff] %vm400_vm6, %v986_v3  ;;  %v987_v5 = vadd.f32 %v982_v46, %v895_v4 }
 0x1bf   : > { %989 = vst.msk [vmem:[#allocation2 + $0x8] sm:$0x3f] %vm402_vm7, %v987_v5 }
 0x1c4   : > { %v990_v6 = vld [vmem:[#allocation2] sm:$0xff] }
 0x1c5   : > { %v1067_v7 = vadd.f32 %v1060_v49, %v990_v6 }
 0x1c6   : > { %v991_v8 = vld [vmem:[#allocation2 + $0x8] sm:$0x3f] }
 0x1c7   : > { %1069 = vst.msk [vmem:[#allocation2] sm:$0xff] %vm400_vm6, %v1067_v7  ;;  %v1068_v9 = vadd.f32 %v1063_v51, %v991_v8 }
 0x1c9   : > { %1070 = vst.msk [vmem:[#allocation2 + $0x8] sm:$0x3f] %vm402_vm7, %v1068_v9 }
 0x1ce   : > { %v1071_v11 = vld [vmem:[#allocation2] sm:$0xff] }
 0x1cf   : > { %v1080_v12 = vadd.f32 %v1318_v10, %v1071_v11 }
 0x1d0   : > { %v1072_v13 = vld [vmem:[#allocation2 + $0x8] sm:$0xf] }
 0x1d1   : > { %v1081_v15 = vadd.f32 %v1318_v10, %v1072_v13  ;;  %v1082_v16 = vmul.f32 0.1, %v1080_v12 }
 0x1d3   : > { %v1083_v18 = vmul.f32 0.1, %v1081_v15  ;;  %v1084_v19 = vmax.f32 %v1080_v12, %v1082_v16 }
 0x1d5   : > { %v1085_v21 = vmax.f32 %v1081_v15, %v1083_v18  ;;  %v1090_v22 = vadd.f32 %v1088_v17, %v1084_v19 }
 0x1d7   : > { %v1091_v23 = vadd.f32 %v1089_v20, %v1085_v21  ;;  %v1327_v24 = vpack.c.bf16 %v1090_v22, %v1090_v22 }
 0x1d9   : > { %v1328_v25 = vpack.c.bf16 %v1091_v23, %v1091_v23  ;;  %1101 = vst.msk [vmem:[%s330_s26] sm:$0xf] %vm1100_vm8, %v1327_v24 }
 0x1db   : > { %1103 = vst.msk [vmem:[%s330_s26 + $0x4] sm:$0x3] %vm1102_vm9, %v1328_v25 }
 0x1dc   : > { %1687 = shalt.err (!%p1684_p13)
}
 0x1dd   : > { %s1688_s5 = scalar_lea.hbm %s2154_s21, 128  ;;  %s1692_s6 = scalar_lea.hbm %s2208_s4, 1536 }
 0x1de   : > { %p1689_p3 = scmp.ne.s32.totalorder %s2154_s21, %s1688_s5  ;;  %p1693_p0 = scmp.lt.u32.totalorder %s2154_s21, %s2208_s4 }
 0x1df   : > { %p1694_p10 = scmp.lt.u32.totalorder %s1692_s6, %s1688_s5  ;;  %p1696_p12 = scmp.lt.u32.totalorder %s1688_s5, %s2154_s21 }
 0x1e0   : > { %p1690_p2 = pnand %p1689_p3, %p2235_p7 }
 0x1e1   : > { %p1695_p9 = por %p1694_p10, %p1693_p0 }
 0x1e2   : > { %p1691_p8 = pneg %p1690_p2 }
 0x1e3   : > { %p1697_p6 = por %p1696_p12, %p1695_p9 }
 0x1e5   : > { %p1698_p11 = pnand %p1697_p6, %p1691_p8 }
 0x1e7   : > { %1701 = shalt.err (!%p1698_p11)
}
 0x1e8   : > { %s1775_s1 = smov 64   ;;  %s1776_s29 = smov 4  }
 0x1e9   : > { %1444 = dma.vmem_to_hbm [thread:$0]  (%p2235_p7), %s2156_s10, 128, %s2154_s21, %s1105_s18, %s1775_s1, %s1775_s1, %s1776_s29  }
 0x1ea PF: > { %p1469_p5 = scmp.ge.s32.totalorder %s1764_s20, 2  ;;  %s1136_s24 = sand.u32 1, %s1744_s15  }
 0x1eb   : > { %p2236_p1 = scmp.ne.s32.totalorder %s2222_s28, 0  ;;  %s1137_s26 = scalar_lea.sflag [#allocation5], %s1136_s24 }
 0x1ed   : > { %p1461_p4 = pnand %p1469_p5, %p2236_p1 }
 0x1ef   : > { %1739 = dma.done.wait (!%p1461_p4), %s1137_s26, 128  }
 0x1f0   : > { %1741 = vsyncadd (!%p1461_p4), %s1137_s26, 4294967168  ;;  %s24_s20 = sadd.s32 1, %s1764_s20   ;;  %s2237_s15 = smov %s1748_s16 }
 0x1f1   : > { %p21_p13 = scmp.ge.s32.totalorder %s24_s20, 14   ;;  %s2238_s16 = smov %s1752_s17 }
 0x1f2   : > { %s2239_s17 = smov %s1965_s7  ;;  %s2240_s18 = smov %s1760_s19 }
 0x1f3   : > { %s2241_s19 = smov %s2243_s14  ;;  %23 = sbr.rel (!%p21_p13) target bundleno = 13 (0xd), region = 112 }
 0x1fa   :  { %1142 = vsyncpa [#allocation4], 1 }
 0x1fb   :  { %1144 = vsyncpa [#allocation4 + $0x1], 1 }
 0x1fc   :  { %1145 = vsyncpa [#allocation7], 1 }
 0x1fd   :  { %1146 = vsyncpa [#allocation10], 1 }
 0x1fe   :  { %1148 = vsyncpa [#allocation10 + $0x1], 1 }
 0x1ff   :  { %1149 = vsyncpa [#allocation5], 1 }
 0x200   :  { %1151 = vsyncpa [#allocation5 + $0x1], 1 }

</bundles_post_ra>
